<compile_context>
chip_gen: v7x
topology: tpu7x:2x2x1
jax: 0.10.0
libtpu: 0.0.40
codegen_flags: <defaults>
</compile_context>

<pallas_src>
import math

import jax
import jax.numpy as jnp
from jax.experimental import pallas as pl
from jax.experimental.pallas import tpu as pltpu


# ---------------------------------------------------------------------------
# Kernels
# ---------------------------------------------------------------------------

def _fire_fc_kernel_fullk(x_ref, w_ref, b_ref, o_ref):
    # x_ref: (tm, Kp) f32   w_ref: (Kp, tn) bf16   b_ref: (1, tn) f32
    # Single K block: no accumulator scratch, bias + Heaviside fused inline.
    xb = x_ref[...].astype(w_ref.dtype)
    u = jnp.dot(xb, w_ref[...], preferred_element_type=jnp.float32) + b_ref[...]
    o_ref[...] = jnp.where(u > 0.0, 1.0, 0.0).astype(o_ref.dtype)


def _fire_fc_kernel_ktiled(x_ref, w_ref, b_ref, o_ref, acc_ref):
    # Fallback for very large Cin: f32 VMEM accumulator resident across K.
    k = pl.program_id(2)

    @pl.when(k == 0)
    def _():
        acc_ref[...] = jnp.zeros_like(acc_ref)

    acc_ref[...] += jnp.dot(
        x_ref[...].astype(w_ref.dtype), w_ref[...],
        preferred_element_type=jnp.float32,
    )

    @pl.when(k == pl.num_programs(2) - 1)
    def _():
        u = acc_ref[...] + b_ref[...]
        o_ref[...] = jnp.where(u > 0.0, 1.0, 0.0).astype(o_ref.dtype)


# ---------------------------------------------------------------------------
# Wrapper
# ---------------------------------------------------------------------------

def _round_up(x, m):
    return ((x + m - 1) // m) * m


def _pick_tile(padded, cap, align):
    """Largest multiple of `align` <= cap that divides `padded` (padded % align == 0)."""
    t = min(cap, padded)
    t = max(align, (t // align) * align)
    while padded % t:
        t -= align
    return t


def prepare_fire_fc_params(weight, bias, *, param_dtype=jnp.bfloat16):
    """One-time parameter prep (hoist out of the per-timestep hot path).

    weight: (Cout, Cin), bias: (Cout,)
    Returns (w_kn, bias2d): weight padded to 128-multiples, cast to bf16 and
    transposed to (Kp, Np) = (Cin_pad, Cout_pad) MXU-preferred layout, plus a
    (1, Np) f32 bias row.  Zero padding keeps the matmul exact.
    """
    Cout, Cin = weight.shape
    Kp = _round_up(Cin, 128)
    Np = _round_up(Cout, 128)
    w = jnp.asarray(weight, param_dtype)
    if (Np, Kp) != (Cout, Cin):
        w = jnp.pad(w, ((0, Np - Cout), (0, Kp - Cin)))
    w_kn = jnp.transpose(w)                                   # (Kp, Np)
    b = jnp.asarray(bias, jnp.float32)
    if Np != Cout:
        b = jnp.pad(b, (0, Np - Cout))
    return w_kn, b.reshape(1, Np)


def fire_fc(x, w_kn, bias2d, cout, *, out_dtype=jnp.float32):
    """x: (B, Cin) f32; w_kn/bias2d from prepare_fire_fc_params -> spikes (B, cout)."""
    B, Cin = x.shape
    Kp, Np = w_kn.shape
    assert Kp >= Cin and Np >= cout and bias2d.shape == (1, Np)

    Bp = _round_up(B, 8)
    # x is the small stream: keep it f32 in HBM (kernel casts to bf16 on the
    # VPU); pad only when the problem is not already 8/128 aligned.
    if (Bp, Kp) != (B, Cin):
        x = jnp.pad(x, ((0, Bp - B), (0, Kp - Cin)))

    # Divisor tiles of the 8/128-padded sizes (no tile-induced padding).
    # Worst case (tm=512, tk=2048, tn=512) working set with double buffering:
    #   2*(512*2048*4 + 2048*512*2) + 2*512*512*4 + 512*512*4 ~= 15 MiB  < 32 MiB.
    tm = _pick_tile(Bp, 512, 8)        # big tm => weight streamed only Bp/tm times
    tn = _pick_tile(Np, 512, 128)
    tk = _pick_tile(Kp, 2048, 128)     # full-K collapse for Cin <= 2048

    # v7x megacore: try to expose >= 2 parallel blocks when the problem allows.
    if (Bp // tm) * (Np // tn) == 1:
        if Np // 128 >= 2:
            tn = _pick_tile(Np, max(128, Np // 2), 128)
        elif Bp // 8 >= 2:
            tm = _pick_tile(Bp, max(8, Bp // 2), 8)

    ni, nj, nk = Bp // tm, Np // tn, Kp // tk

    x_bytes = jnp.dtype(x.dtype).itemsize
    w_bytes = jnp.dtype(w_kn.dtype).itemsize
    o_bytes = jnp.dtype(out_dtype).itemsize
    cost = pl.CostEstimate(
        flops=2 * Bp * Kp * Np,
        transcendentals=0,
        bytes_accessed=(Bp * Kp * x_bytes          # x streamed once
                        + ni * Kp * Np * w_bytes   # weight re-streamed per M block
                        + Np * 4
                        + Bp * Np * o_bytes),
    )

    if nk == 1:
        kernel = _fire_fc_kernel_fullk
        grid = (ni, nj)
        in_specs = [
            pl.BlockSpec((tm, Kp), lambda i, j: (i, 0)),    # x (stays resident over j)
            pl.BlockSpec((Kp, tn), lambda i, j: (0, j)),    # weight, (Cin, Cout) layout
            pl.BlockSpec((1, tn), lambda i, j: (0, j)),     # bias
        ]
        out_specs = pl.BlockSpec((tm, tn), lambda i, j: (i, j))
        scratch_shapes = []
        semantics = ("parallel", "parallel")
    else:
        kernel = _fire_fc_kernel_ktiled
        grid = (ni, nj, nk)
        in_specs = [
            pl.BlockSpec((tm, tk), lambda i, j, k: (i, k)),
            pl.BlockSpec((tk, tn), lambda i, j, k: (k, j)),
            pl.BlockSpec((1, tn), lambda i, j, k: (0, j)),
        ]
        out_specs = pl.BlockSpec((tm, tn), lambda i, j, k: (i, j))
        scratch_shapes = [pltpu.VMEM((tm, tn), jnp.float32)]
        semantics = ("parallel", "parallel", "arbitrary")

    out = pl.pallas_call(
        kernel,
        out_shape=jax.ShapeDtypeStruct((Bp, Np), out_dtype),
        grid_spec=pltpu.PrefetchScalarGridSpec(
            num_scalar_prefetch=0,
            grid=grid,
            in_specs=in_specs,
            out_specs=out_specs,
            scratch_shapes=scratch_shapes,
        ),
        compiler_params=pltpu.CompilerParams(
            dimension_semantics=semantics,
            vmem_limit_bytes=32 * 1024 * 1024,   # explicit: v5e default is 16 MiB,
                                                 # v7x physical is 64 MiB
        ),
        cost_estimate=cost,
    )(x, w_kn, bias2d)

    return out[:B, :cout]


# ---------------------------------------------------------------------------
# Reference / check
# ---------------------------------------------------------------------------

def _check(x, weight, bias, out, *, param_dtype=jnp.bfloat16, eps=1e-3):
    """Spike comparison against a bf16-faithful reference; ignore potentials
    numerically at the threshold (|u| <= eps) where rounding can flip a spike."""
    xq = x.astype(param_dtype).astype(jnp.float32)
    wq = weight.astype(param_dtype).astype(jnp.float32)
    pot = xq @ wq.T + bias[None, :]
    ref = (pot > 0.0).astype(jnp.float32)
    safe = jnp.abs(pot) > eps
    in_01 = jnp.all((out == 0.0) | (out == 1.0))
    agree = jnp.all(jnp.where(safe, out.astype(jnp.float32) == ref, True))
    return bool(in_01) and bool(agree)


if __name__ == "__main__":
    key = jax.random.PRNGKey(0)

    # --- Case 1: tiny shapes consistent with the module (single block). ---
    batch, cin, cout = 8, 32, 32
    kx, kw, key = jax.random.split(key, 3)
    # Parameter init mirroring the module: weight ~ N(0, 0.75/sqrt(cin)), bias = 0.
    weight = jax.random.normal(kw, (cout, cin), dtype=jnp.float32) * (0.75 / math.sqrt(cin))
    bias = jnp.zeros((cout,), dtype=jnp.float32)
    x = jax.random.normal(kx, (batch, cin), dtype=jnp.float32)

    w_kn, b2d = prepare_fire_fc_params(weight, bias)
    out = jax.block_until_ready(fire_fc(x, w_kn, b2d, cout))
    assert out.shape == (batch, cout)
    assert _check(x, weight, bias, out)

    # --- Case 2: larger shapes exercising N tiling, full-K collapse, megacore. ---
    batch2, cin2, cout2 = 48, 640, 640
    kx2, kw2, kb2 = jax.random.split(key, 3)
    weight2 = jax.random.normal(kw2, (cout2, cin2), dtype=jnp.float32) * (0.75 / math.sqrt(cin2))
    bias2 = 0.01 * jax.random.normal(kb2, (cout2,), dtype=jnp.float32)
    x2 = jax.random.normal(kx2, (batch2, cin2), dtype=jnp.float32)

    w_kn2, b2d2 = prepare_fire_fc_params(weight2, bias2)
    out2 = jax.block_until_ready(fire_fc(x2, w_kn2, b2d2, cout2))
    assert out2.shape == (batch2, cout2)
    assert _check(x2, weight2, bias2, out2)

    print("KERNEL_OK")
</pallas_src>

<mosaic_0001>
module attributes {stable_mosaic.version = 11 : i64} {
  func.func @_fire_fc_kernel_fullk(%arg0: i32, %arg1: i32, %arg2: memref<8x128xf32, #tpu.memory_space<vmem>>, %arg3: memref<128x128xbf16, #tpu.memory_space<vmem>>, %arg4: memref<1x128xf32, #tpu.memory_space<vmem>>, %arg5: memref<8x128xf32, #tpu.memory_space<vmem>>) attributes {dimension_semantics = [#tpu.dimension_semantics<parallel>, #tpu.dimension_semantics<parallel>], iteration_bounds = array<i64: 1, 1>, scalar_prefetch = 0 : i64, scratch_operands = 0 : i64, tpu.core_type = #tpu.core_type<tc>, window_params = [{transform_indices = @transform_0, window_bounds = array<i64: 8, 128>}, {transform_indices = @transform_1, window_bounds = array<i64: 128, 128>}, {transform_indices = @transform_2, window_bounds = array<i64: 1, 128>}, {transform_indices = @transform_3, window_bounds = array<i64: 8, 128>}]} {
    %c0 = arith.constant 0 : index
    %c0_0 = arith.constant 0 : index
    %0 = vector.load %arg2[%c0, %c0_0] : memref<8x128xf32, #tpu.memory_space<vmem>>, vector<8x128xf32>
    %1 = arith.truncf %0 : vector<8x128xf32> to vector<8x128xbf16>
    %c0_1 = arith.constant 0 : index
    %c0_2 = arith.constant 0 : index
    %2 = vector.load %arg3[%c0_1, %c0_2] : memref<128x128xbf16, #tpu.memory_space<vmem>>, vector<128x128xbf16>
    %cst = arith.constant dense<0.000000e+00> : vector<8x128xf32>
    %3 = tpu.matmul %1, %2, %cst {dimension_numbers = #tpu.dot_dimension_numbers<[1], [0], [0], [1], [0, 0, 1, 1], [], []>} : vector<8x128xbf16>, vector<128x128xbf16>, vector<8x128xf32> -> vector<8x128xf32>
    %c0_3 = arith.constant 0 : index
    %c0_4 = arith.constant 0 : index
    %4 = vector.load %arg4[%c0_3, %c0_4] : memref<1x128xf32, #tpu.memory_space<vmem>>, vector<1x128xf32>
    %5 = vector.broadcast %4 : vector<1x128xf32> to vector<8x128xf32>
    %6 = arith.addf %3, %5 : vector<8x128xf32>
    %cst_5 = arith.constant 0.000000e+00 : f32
    %7 = vector.broadcast %cst_5 : f32 to vector<8x128xf32>
    %8 = arith.cmpf ogt, %6, %7 : vector<8x128xf32>
    %cst_6 = arith.constant 1.000000e+00 : f32
    %cst_7 = arith.constant 0.000000e+00 : f32
    %9 = vector.broadcast %cst_6 : f32 to vector<8x128xf32>
    %10 = vector.broadcast %cst_7 : f32 to vector<8x128xf32>
    %11 = arith.select %8, %9, %10 : vector<8x128xi1>, vector<8x128xf32>
    %c0_8 = arith.constant 0 : index
    %c0_9 = arith.constant 0 : index
    %12 = vector.load %arg5[%c0_8, %c0_9] : memref<8x128xf32, #tpu.memory_space<vmem>>, vector<8x128xf32>
    tpu.vector_store %arg5[%c0_8, %c0_9], %11 {strides = array<i32>} : memref<8x128xf32, #tpu.memory_space<vmem>>, vector<8x128xf32>,
    return
  }
  func.func @transform_0(%arg0: i32, %arg1: i32) -> (i32, i32) {
    %c0_i32 = arith.constant 0 : i32
    %c0_i32_0 = arith.constant 0 : i32
    return %arg0, %c0_i32 : i32, i32
  }
  func.func @transform_1(%arg0: i32, %arg1: i32) -> (i32, i32) {
    %c0_i32 = arith.constant 0 : i32
    %c0_i32_0 = arith.constant 0 : i32
    return %c0_i32, %arg1 : i32, i32
  }
  func.func @transform_2(%arg0: i32, %arg1: i32) -> (i32, i32) {
    %c0_i32 = arith.constant 0 : i32
    %c0_i32_0 = arith.constant 0 : i32
    return %c0_i32, %arg1 : i32, i32
  }
  func.func @transform_3(%arg0: i32, %arg1: i32) -> (i32, i32) {
    %c0_i32 = arith.constant 0 : i32
    return %arg0, %arg1 : i32, i32
  }
}

</mosaic_0001>

<bundles_post_ra>
// kernel: tpu_custom_call.1
= control target key start
LH: loop header
LB: loop body
LE: loop exit
PB: predicated region body
PF: predicated region fallthrough
CT: control target
= control target key end

     0   :  { %8 = vsyncpa [#allocation3], 0  ;;  %s372_s0 = inlined_call_operand.hbm [shape: f32[8,128], index: 0, kind: input, shape index: {}]   ;;  %s373_s1 = inlined_call_operand.hbm [shape: bf16[128,128], index: 1, kind: input, shape index: {}]   ;;  %s374_s2 = inlined_call_operand.vmem [shape: f32[1,128], index: 2, kind: input, shape index: {}]   ;;  %s375_s3 = inlined_call_operand.hbm [shape: f32[8,128], index: 3, kind: output, shape index: {}]  }
   0x1   :  { %9 = vsyncpa [#allocation6], 0 }
   0x2   :  { %10 = vsyncpa [#allocation4], 0  ;;  %s299_s12 = smov [#allocation2]   ;;  %s300_s14 = smov [#allocation5]  }
   0x3   :  { %s17_s13 = sshll.u32 %s299_s12, 4  ;;  %s26_s15 = sshll.u32 %s300_s14, 4  ;;  %s18_s13 = int_to_ptr.vmem [resolvable:$true] %s17_s13  ;;  %s326_s15 = int_to_ptr.vmem [resolvable:$true] %s26_s15 }
   0x4   :  { %s227_s18 = scalar_lea.hbm %s372_s0, 128 }
   0x5   :  { %p228_p0 = scmp.ne.s32.totalorder %s372_s0, %s227_s18  ;;  %p231_p1 = scmp.lt.u32.totalorder %s227_s18, %s372_s0 }
   0x7   :  { %p233_p2 = pnand %p231_p1, %p228_p0 }
   0x9   :  { %236 = shalt.err (!%p233_p2)
}
   0xa   :  { %s237_s23 = scalar_lea.vmem %s18_s13, 128  ;;  %p242_p4 = scmp.lt.s32.totalorder %s18_s13, %s18_s13 }
   0xb   :  { %p238_p3 = scmp.ne.s32.totalorder %s18_s13, %s237_s23  ;;  %p243_p5 = scmp.lt.s32.totalorder %s237_s23, %s237_s23 }
   0xd   :  { %p244_p6 = por %p243_p5, %p242_p4 }
   0xf   :  { %p245_p7 = pnand %p244_p6, %p238_p3 }
  0x11   :  { %248 = shalt.err (!%p245_p7)
}
  0x12   :  { %20 = dma.hbm_to_vmem [thread:$0]  %s372_s0, 128, %s18_s13, [#allocation3]  }
  0x13   :  { %s249_s28 = scalar_lea.hbm %s373_s1, 1024 }
  0x14   :  { %p250_p8 = scmp.ne.s32.totalorder %s373_s1, %s249_s28  ;;  %p253_p9 = scmp.lt.u32.totalorder %s249_s28, %s373_s1 }
  0x16   :  { %p255_p10 = pnand %p253_p9, %p250_p8 }
  0x18   :  { %258 = shalt.err (!%p255_p10)
}
  0x19   :  { %s259_s6 = scalar_lea.vmem %s326_s15, 1024  ;;  %p264_p12 = scmp.lt.s32.totalorder %s326_s15, %s326_s15 }
  0x1a   :  { %p260_p11 = scmp.ne.s32.totalorder %s326_s15, %s259_s6  ;;  %p265_p13 = scmp.lt.s32.totalorder %s259_s6, %s259_s6 }
  0x1c   :  { %p266_p0 = por %p265_p13, %p264_p12 }
  0x1e   :  { %p267_p1 = pnand %p266_p0, %p260_p11 }
  0x20   :  { %270 = shalt.err (!%p267_p1)
}
  0x21   :  { %s301_s0 = smov 64   ;;  %s302_s7 = smov 4  }
  0x22   :  { %32 = dma.hbm_to_vmem [thread:$0]  %s373_s1, 1024, %s326_s15, [#allocation6], %s301_s0, %s301_s0, %s302_s7  }
  0x23   :  { %293 = dma.done.wait [#allocation3], 128  }
  0x24   :  { %294 = vsyncadd [#allocation3], 4294967168 }
  0x25   :  { %295 = dma.done.wait [#allocation6], 1024  }
  0x26   :  { %296 = vsyncadd [#allocation6], 4294966272  ;;  %v303_v0 = vmov 0.0   ;;  %vm304_vm0 = vmmov 0   ;;  %v219_v1 = vld [vmem:[#allocation5] sm:$0xff]   ;;  %v220_v2 = vld [vmem:[#allocation5 + $0x8] sm:$0xff]  }
  0x27   :  { %192 = vmatprep.subr.bf16.mxu0 %v303_v0  ;;  %208 = vmatprep.mubr.msk.bf16.mxu0 %vm304_vm0, %v303_v0  ;;  %v221_v3 = vld [vmem:[#allocation5 + $0x10] sm:$0xff]   ;;  %v222_v4 = vld [vmem:[#allocation5 + $0x18] sm:$0xff]   ;;  %v223_v5 = vld [vmem:[#allocation5 + $0x20] sm:$0xff]   ;;  %s305_s11 = smov [#allocation7]  }
  0x28   :  { %193 = vmatpush3.bf16.msra.mxu0 %v219_v1  ;;  %v224_v6 = vld [vmem:[#allocation5 + $0x28] sm:$0xff]   ;;  %v225_v7 = vld [vmem:[#allocation5 + $0x30] sm:$0xff]   ;;  %v226_v8 = vld [vmem:[#allocation5 + $0x38] sm:$0xff]   ;;  %s164_s12 = sshll.u32 %s305_s11, 4  ;;  %s165_s12 = int_to_ptr.vmem [resolvable:$true] %s164_s12 }
  0x29   :  { %194 = vmatprep.subr.bf16.mxu0 %v303_v0  ;;  %v42_v9 = vld [vmem:[#allocation2] sm:$0xff]  ;;  %s271_s13 = scalar_lea.vmem %s165_s12, 128  ;;  %p276_p3 = scmp.lt.s32.totalorder %s165_s12, %s165_s12 }
  0x2a   :  { %v43_v10 = vpack.c.bf16 %v42_v9, %v42_v9  ;;  %v174_v11 = vld [vmem:[%s374_s2] ss:$0 sm:$0xff]  ;;  %p272_p2 = scmp.ne.s32.totalorder %s165_s12, %s271_s13  ;;  %p277_p4 = scmp.lt.s32.totalorder %s271_s13, %s271_s13 }
  0x2c   :  { %195 = vmatpush3.bf16.msra.mxu0 %v220_v2  ;;  %p278_p5 = por %p277_p4, %p276_p3 }
  0x2d   :  { %196 = vmatprep.subr.bf16.mxu0 %v303_v0 }
  0x2e   :  { %p279_p6 = pnand %p278_p5, %p272_p2 }
  0x30   :  { %197 = vmatpush3.bf16.msra.mxu0 %v221_v3 }
  0x31   :  { %198 = vmatprep.subr.bf16.mxu0 %v303_v0 }
  0x34   :  { %199 = vmatpush3.bf16.msra.mxu0 %v222_v4 }
  0x35   :  { %200 = vmatprep.subr.bf16.mxu0 %v303_v0 }
  0x38   :  { %201 = vmatpush3.bf16.msra.mxu0 %v223_v5 }
  0x39   :  { %202 = vmatprep.subr.bf16.mxu0 %v303_v0 }
  0x3c   :  { %203 = vmatpush3.bf16.msra.mxu0 %v224_v6 }
  0x3d   :  { %204 = vmatprep.subr.bf16.mxu0 %v303_v0 }
  0x40   :  { %205 = vmatpush3.bf16.msra.mxu0 %v225_v7 }
  0x41   :  { %206 = vmatprep.subr.bf16.mxu0 %v303_v0 }
  0x44   :  { %207 = vmatpush3.bf16.msra.mxu0 %v226_v8 }
  0x47   :  { %209 = vmatmul.mubr.bf16.vlgmr.msra.gmra.mrb[0].mxu0 %v43_v10 }
 0x11a   :  { %v149_v12 = vpop.f32.mrb[0].mxu0 }
 0x11b   :  { %v150_v13 = vadd.f32 %v174_v11, %v149_v12  ;;  %v210_v14 = vpop.f32.mrb[1].mxu0 }
 0x11c   :  { %v152_v15 = vpop.f32.mrb[2].mxu0 }
 0x11d   :  { %vm155_vm1 = vcmp.gt.f32.partialorder %v150_v13, 0.0  ;;  %v211_v16 = vpop.f32.mrb[3].mxu0 }
 0x11e   :  { %v156_v17 = vsel %vm155_vm1, 1.0, %v303_v0 }
 0x11f   :  { %157 = vst [vmem:[#allocation7] sm:$0xff] %v156_v17 }
 0x120   :  { %282 = shalt.err (!%p279_p6)
}
 0x121   :  { %s283_s15 = scalar_lea.hbm %s375_s3, 128 }
 0x122   :  { %p284_p7 = scmp.ne.s32.totalorder %s375_s3, %s283_s15  ;;  %p287_p8 = scmp.lt.u32.totalorder %s283_s15, %s375_s3 }
 0x124   :  { %p289_p9 = pnand %p287_p8, %p284_p7 }
 0x126   :  { %292 = shalt.err (!%p289_p9)
}
 0x127   :  { %167 = dma.vmem_to_hbm [thread:$0]  %s165_s12, 128, %s375_s3, [#allocation4]  }
 0x128   :  { %297 = dma.done.wait [#allocation4], 128  }
 0x129   :  { %298 = vsyncadd [#allocation4], 4294967168 }
 0x12a   :  { %171 = vsyncpa [#allocation3], 1 }
 0x12b   :  { %172 = vsyncpa [#allocation6], 1 }
 0x12c   :  { %173 = vsyncpa [#allocation4], 1 }

</bundles_post_ra>
